<compile_context>
chip_gen: v7x
topology: tpu7x:2x2x1
jax: 0.10.0
libtpu: 0.0.40
codegen_flags: <defaults>
</compile_context>

<pallas_src>
import jax
import jax.numpy as jnp
from jax.experimental import pallas as pl
from jax.experimental.pallas import tpu as pltpu


# ----------------------------- tiling helpers ------------------------------

_TARGET_BLOCK_BYTES = 4 << 20    # ~4 MiB blocks: at the measured roofline knee
_BLOCK_FLOOR_BYTES = 512 << 10   # below this, per-step overhead starts to show
_MIN_GRID_STEPS = 8              # >= 2-4 pipelined steps per core on v7x (2 TC)


def _round_up(v: int, m: int) -> int:
    return -(-v // m) * m


def _sublane_multiple(itemsize: int) -> int:
    # Native sublane packing: f32 -> 8, bf16 -> 16, int8 -> 32.
    return 8 * max(1, 4 // itemsize)


def _padded_block_bytes(block_shape, itemsize: int, sub: int) -> int:
    """VMEM bytes of a block after (sublane, lane) tile padding of the last two dims."""
    *lead, s, l = block_shape
    lead_elems = 1
    for d in lead:
        lead_elems *= d
    return lead_elems * _round_up(s, sub) * _round_up(l, 128) * itemsize


def _vmem_caps():
    """Return (double-buffered footprint cap, vmem_limit_bytes) per generation."""
    phys = 64 << 20                       # conservative default = v7x per-TC VMEM
    try:
        phys = int(getattr(pltpu.get_tpu_info(), "vmem_capacity_bytes", phys))
    except Exception:
        pass
    if phys <= (64 << 20):                # v7x-class: 64 MiB per TensorCore
        return 24 << 20, 40 << 20
    return 32 << 20, 64 << 20             # v5e / v6e: 128 MiB physical VMEM


def _pick_tiles(b, n, g, hw, itemsize, sub, aligned, cap_bytes):
    """Pick divisor tiles (tb, tn) by padded VMEM footprint, not logical bytes."""
    tb_cands = [d for d in range(1, b + 1) if b % d == 0]
    # TN is the second-to-last block dim of both specs: it must be a sublane
    # multiple or the full extent N to satisfy the (8,128) block rule.
    tn_cands = [d for d in range(1, n + 1) if n % d == 0 and (d % sub == 0 or d == n)]

    def block_bytes(tb, tn):
        in_blk = _padded_block_bytes((tb, g, tn, hw), itemsize, sub)
        if aligned:
            out_blk = _padded_block_bytes((tb, tn, g * hw), itemsize, sub)
        else:
            out_blk = _padded_block_bytes((tb, tn, g, hw), itemsize, sub)
        return in_blk + out_blk

    best = None
    for tb in tb_cands:
        for tn in tn_cands:
            blk = block_bytes(tb, tn)
            footprint = 2 * blk                      # double-buffered in + out
            if footprint > cap_bytes:
                continue
            steps = (b // tb) * (n // tn)
            key = (min(blk, _BLOCK_FLOOR_BYTES),     # 1) escape tiny-tile regime
                   min(steps, _MIN_GRID_STEPS),      # 2) enough steps to pipeline
                   min(blk, _TARGET_BLOCK_BYTES),    # 3) grow toward the knee
                   steps)                            # 4) tie-break: finer split
            if best is None or key > best[0]:
                best = (key, tb, tn, footprint)

    if best is None:
        # Even the smallest legal block busts the cap (enormous H*W): take it
        # anyway and let the caller raise vmem_limit_bytes to cover it.
        # TODO(synk): additionally tile the H*W axis if such shapes ever occur.
        tb, tn = 1, tn_cands[0]
        return tb, tn, 2 * block_bytes(tb, tn)
    return best[1], best[2], best[3]


# --------------------------------- kernel ----------------------------------

def _shuffle_kernel(x_ref, o_ref):
    # x_ref: (TB, G, TN, HW).  o_ref: (TB, TN, G*HW) or (TB, TN, G, HW).
    # The HBM<->VMEM DMAs (BlockSpec pipelining) move dense slabs; this body
    # only re-arranges the group axis inside VMEM with G small, static stores.
    g = x_ref.shape[1]
    hw = x_ref.shape[3]
    for gi in range(g):                              # static unroll, G in {2,3,4,8}
        part = x_ref[:, gi, :, :]                    # (TB, TN, HW)
        if o_ref.ndim == 3:                          # lane-aligned: HW % 128 == 0
            o_ref[:, :, gi * hw:(gi + 1) * hw] = part
        else:                                        # full-extent (G, HW) trailing
            o_ref[:, :, gi, :] = part


def channel_shuffle(x: jax.Array, num_groups: int) -> jax.Array:
    b, c, h, w = x.shape
    g = num_groups
    assert c % g == 0, "channels must be divisible by num_groups"
    n = c // g
    hw = h * w
    itemsize = jnp.dtype(x.dtype).itemsize
    sub = _sublane_multiple(itemsize)
    aligned = (hw % 128 == 0)

    cap_bytes, vmem_limit = _vmem_caps()
    tb, tn, footprint = _pick_tiles(b, n, g, hw, itemsize, sub, aligned, cap_bytes)
    vmem_limit = max(vmem_limit, footprint + (2 << 20))

    grid = (b // tb, n // tn)

    x_view = x.reshape(b, g, n, hw)                  # contiguous reshape: free
    in_spec = pl.BlockSpec((tb, g, tn, hw), lambda bi, ni: (bi, 0, ni, 0))
    if aligned:
        out_shape = jax.ShapeDtypeStruct((b, n, g * hw), x.dtype)
        out_spec = pl.BlockSpec((tb, tn, g * hw), lambda bi, ni: (bi, ni, 0))
    else:
        out_shape = jax.ShapeDtypeStruct((b, n, g, hw), x.dtype)
        out_spec = pl.BlockSpec((tb, tn, g, hw), lambda bi, ni: (bi, ni, 0, 0))

    out = pl.pallas_call(
        _shuffle_kernel,
        out_shape=out_shape,
        grid=grid,
        in_specs=[in_spec],
        out_specs=out_spec,
        compiler_params=pltpu.CompilerParams(
            dimension_semantics=("parallel", "parallel"),
            vmem_limit_bytes=int(vmem_limit)),
        cost_estimate=pl.CostEstimate(
            flops=0, transcendentals=0,
            bytes_accessed=2 * b * c * hw * itemsize),
    )(x_view)

    # Row-major (B, N, G*HW) / (B, N, G, HW) == (B, C, H, W) with
    # out channel = n*G + g  <-  in channel = g*N + n: exactly PyTorch's result.
    # TODO(synk): in the full ShuffleNet model, fold this permutation into the
    # adjacent conv's BlockSpec index_map instead of a standalone HBM copy.
    return out.reshape(b, c, h, w)


def channel_shuffle_ref(x: jax.Array, num_groups: int) -> jax.Array:
    # Pure-JAX reference replicating the PyTorch forward exactly.
    b, c, h, w = x.shape
    n = c // num_groups
    y = x.reshape(b, num_groups, n, h, w)
    y = jnp.transpose(y, (0, 2, 1, 3, 4))
    return y.reshape(b, c, h, w)


if __name__ == "__main__":
    key = jax.random.PRNGKey(0)

    # Primary check (lane-aligned path: H*W = 256).
    b, c, h, w = 2, 4, 16, 16
    num_groups = 2
    x = jax.random.normal(key, (b, c, h, w), dtype=jnp.float32)
    out = jax.block_until_ready(channel_shuffle(x, num_groups))
    expected = channel_shuffle_ref(x, num_groups)
    assert out.shape == expected.shape and out.dtype == expected.dtype
    assert jnp.array_equal(out, expected), "channel shuffle mismatch (aligned path)"

    # Secondary check (H*W = 49, not a multiple of 128: 4-D output view path).
    x2 = jax.random.normal(jax.random.PRNGKey(0), (2, 6, 7, 7), dtype=jnp.float32)
    out2 = jax.block_until_ready(channel_shuffle(x2, 3))
    expected2 = channel_shuffle_ref(x2, 3)
    assert jnp.array_equal(out2, expected2), "channel shuffle mismatch (unaligned path)"

    print("KERNEL_OK")
</pallas_src>

<mosaic_0001>
module attributes {stable_mosaic.version = 11 : i64} {
  func.func @_shuffle_kernel(%arg0: i32, %arg1: i32, %arg2: memref<2x2x2x256xf32, #tpu.memory_space<vmem>>, %arg3: memref<2x2x512xf32, #tpu.memory_space<vmem>>) attributes {dimension_semantics = [#tpu.dimension_semantics<parallel>, #tpu.dimension_semantics<parallel>], iteration_bounds = array<i64: 1, 1>, scalar_prefetch = 0 : i64, scratch_operands = 0 : i64, tpu.core_type = #tpu.core_type<tc>, window_params = [{transform_indices = @transform_0, window_bounds = array<i64: 2, 2, 2, 256>}, {transform_indices = @transform_1, window_bounds = array<i64: 2, 2, 512>}]} {
    %c0 = arith.constant 0 : index
    %c0_0 = arith.constant 0 : index
    %c0_1 = arith.constant 0 : index
    %c0_2 = arith.constant 0 : index
    %0 = vector.load %arg2[%c0, %c0_0, %c0_1, %c0_2] : memref<2x2x2x256xf32, #tpu.memory_space<vmem>>, vector<2x1x2x256xf32>
    %1 = vector.shape_cast %0 : vector<2x1x2x256xf32> to vector<2x2x256xf32>
    %c0_3 = arith.constant 0 : index
    %c0_4 = arith.constant 0 : index
    %c0_5 = arith.constant 0 : index
    %2 = vector.load %arg3[%c0_3, %c0_4, %c0_5] : memref<2x2x512xf32, #tpu.memory_space<vmem>>, vector<2x2x256xf32>
    tpu.vector_store %arg3[%c0_3, %c0_4, %c0_5], %1 {strides = array<i32>} : memref<2x2x512xf32, #tpu.memory_space<vmem>>, vector<2x2x256xf32>,
    %c0_6 = arith.constant 0 : index
    %c1 = arith.constant 1 : index
    %c0_7 = arith.constant 0 : index
    %c0_8 = arith.constant 0 : index
    %3 = vector.load %arg2[%c0_6, %c1, %c0_7, %c0_8] : memref<2x2x2x256xf32, #tpu.memory_space<vmem>>, vector<2x1x2x256xf32>
    %4 = vector.shape_cast %3 : vector<2x1x2x256xf32> to vector<2x2x256xf32>
    %c0_9 = arith.constant 0 : index
    %c0_10 = arith.constant 0 : index
    %c256 = arith.constant 256 : index
    %5 = vector.load %arg3[%c0_9, %c0_10, %c256] : memref<2x2x512xf32, #tpu.memory_space<vmem>>, vector<2x2x256xf32>
    tpu.vector_store %arg3[%c0_9, %c0_10, %c256], %4 {strides = array<i32>} : memref<2x2x512xf32, #tpu.memory_space<vmem>>, vector<2x2x256xf32>,
    return
  }
  func.func @transform_0(%arg0: i32, %arg1: i32) -> (i32, i32, i32, i32) {
    %c0_i32 = arith.constant 0 : i32
    %c0_i32_0 = arith.constant 0 : i32
    %c0_i32_1 = arith.constant 0 : i32
    return %arg0, %c0_i32, %arg1, %c0_i32_0 : i32, i32, i32, i32
  }
  func.func @transform_1(%arg0: i32, %arg1: i32) -> (i32, i32, i32) {
    %c0_i32 = arith.constant 0 : i32
    %c0_i32_0 = arith.constant 0 : i32
    return %arg0, %arg1, %c0_i32 : i32, i32, i32
  }
}

</mosaic_0001>

<bundles_post_ra>
// kernel: tpu_custom_call.1
= control target key start
LH: loop header
LB: loop body
LE: loop exit
PB: predicated region body
PF: predicated region fallthrough
CT: control target
= control target key end

     0   :  { %6 = vsyncpa [#allocation3], 0  ;;  %s143_s0 = inlined_call_operand.hbm [shape: f32[2,2,2,256], index: 0, kind: input, shape index: {}]   ;;  %s144_s1 = inlined_call_operand.hbm [shape: f32[2,2,512], index: 1, kind: output, shape index: {}]  }
   0x1   :  { %7 = vsyncpa [#allocation4], 0  ;;  %s103_s6 = smov [#allocation2]   ;;  %s55_s10 = scalar_lea.hbm %s143_s0, 256 }
   0x2   :  { %s13_s7 = sshll.u32 %s103_s6, 4  ;;  %p56_p0 = scmp.ne.s32.totalorder %s143_s0, %s55_s10  ;;  %s14_s7 = int_to_ptr.vmem [resolvable:$true] %s13_s7 }
   0x3   :  { %p59_p1 = scmp.lt.u32.totalorder %s55_s10, %s143_s0 }
   0x5   :  { %p61_p2 = pnand %p59_p1, %p56_p0 }
   0x7   :  { %64 = shalt.err (!%p61_p2)
}
   0x8   :  { %s65_s15 = scalar_lea.vmem %s14_s7, 256  ;;  %p70_p4 = scmp.lt.s32.totalorder %s14_s7, %s14_s7 }
   0x9   :  { %p66_p3 = scmp.ne.s32.totalorder %s14_s7, %s65_s15  ;;  %p71_p5 = scmp.lt.s32.totalorder %s65_s15, %s65_s15 }
   0xb   :  { %p72_p6 = por %p71_p5, %p70_p4 }
   0xd   :  { %p73_p7 = pnand %p72_p6, %p66_p3 }
   0xf   :  { %76 = shalt.err (!%p73_p7)
}
  0x10   :  { %s104_s16 = smov 64   ;;  %s105_s17 = smov 4  }
  0x11   :  { %19 = dma.hbm_to_vmem [thread:$0]  %s143_s0, 256, %s14_s7, [#allocation3], %s104_s16, %s104_s16, %s105_s17  }
  0x12   :  { %99 = dma.done.wait [#allocation3], 256  }
  0x13   :  { %100 = vsyncadd [#allocation3], 4294967040  ;;  %s106_s20 = smov [#allocation5]   ;;  %v23_v0 = vld [vmem:[#allocation2] sm:$0xff]   ;;  %v24_v1 = vld [vmem:[#allocation2 + $0x8] sm:$0xff]  }
  0x14   :  { %s37_s21 = sshll.u32 %s106_s20, 4  ;;  %25 = vst [vmem:[#allocation5] sm:$0xff] %v23_v0   ;;  %26 = vst [vmem:[#allocation5 + $0x8] sm:$0xff] %v24_v1   ;;  %s38_s21 = int_to_ptr.vmem [resolvable:$true] %s37_s21 }
  0x15   :  { %s77_s22 = scalar_lea.vmem %s38_s21, 256  ;;  %p82_p9 = scmp.lt.s32.totalorder %s38_s21, %s38_s21 }
  0x16   :  { %p78_p8 = scmp.ne.s32.totalorder %s38_s21, %s77_s22  ;;  %p83_p10 = scmp.lt.s32.totalorder %s77_s22, %s77_s22 }
  0x18   :  { %p84_p11 = por %p83_p10, %p82_p9 }
  0x1a   :  { %p85_p12 = pnand %p84_p11, %p78_p8 }
  0x1c   :  { %88 = shalt.err (!%p85_p12)
}
  0x1d   :  { %s89_s0 = scalar_lea.hbm %s144_s1, 256 }
  0x1e   :  { %p90_p13 = scmp.ne.s32.totalorder %s144_s1, %s89_s0  ;;  %p93_p0 = scmp.lt.u32.totalorder %s89_s0, %s144_s1 }
  0x20   :  { %p95_p1 = pnand %p93_p0, %p90_p13 }
  0x22   :  { %98 = shalt.err (!%p95_p1)
}
  0x23   :  { %s107_s29 = smov 128   ;;  %s108_s30 = smov 8  }
  0x24   :  { %43 = dma.vmem_to_hbm [thread:$0]  %s38_s21, 256, %s144_s1, [#allocation4], %s107_s29, %s107_s29, %s108_s30  }
  0x25   :  { %101 = dma.done.wait [#allocation4], 256  }
  0x26   :  { %102 = vsyncadd [#allocation4], 4294967040 }
  0x27   :  { %47 = vsyncpa [#allocation3], 1 }
  0x28   :  { %48 = vsyncpa [#allocation4], 1 }

</bundles_post_ra>
